<compile_context>
chip_gen: v7x
topology: tpu7x:2x2x1
jax: 0.10.0
libtpu: 0.0.40
codegen_flags: <defaults>
</compile_context>

<pallas_src>
import jax
import jax.numpy as jnp
from jax.experimental import pallas as pl
from jax.experimental.pallas import tpu as pltpu

INPUT_SIZE = 784
HIDDEN = 50
NUM_CLASSES = 10
HIDDEN_PAD = 128   # hidden dim padded to a full lane width
OUT_PAD = 128      # class dim padded to a full lane width


def mlp_kernel(x_ref, w1_ref, b1_ref, w2_ref, b2_ref, o_ref):
    # fc1: (TB, 784)bf16 @ (784, 128)bf16 -> f32 accumulation on the MXU.
    h = jnp.dot(x_ref[...], w1_ref[...], preferred_element_type=jnp.float32)
    # bias + ReLU in f32 on the VPU (padded lanes stay exactly zero).
    h = jnp.maximum(h + b1_ref[...], 0.0)
    # fc2: (TB, 128)bf16 @ (128, 128)bf16 -> f32 accumulation.
    out = jnp.dot(h.astype(jnp.bfloat16), w2_ref[...],
                  preferred_element_type=jnp.float32)
    o_ref[...] = (out + b2_ref[...]).astype(o_ref.dtype)


def _round_up(n, m):
    return ((n + m - 1) // m) * m


def nn_forward(x, w1, b1, w2, b2, *, block_b=512):
    """Forward pass of NN.

    x:  (B, 784) f32
    w1: (784, 50) f32, b1: (50,) f32   (fc1, (in, out) layout)
    w2: (50, 10)  f32, b2: (10,) f32   (fc2, (in, out) layout)
    Returns (B, 10) f32 logits.
    """
    B = x.shape[0]

    # Zero-pad hidden / class dims to 128 lanes; padded entries are exact
    # zeros so the math is unchanged.
    w1p = jnp.zeros((INPUT_SIZE, HIDDEN_PAD), jnp.bfloat16
                    ).at[:, :HIDDEN].set(w1.astype(jnp.bfloat16))
    b1p = jnp.zeros((1, HIDDEN_PAD), jnp.float32
                    ).at[:, :HIDDEN].set(b1.reshape(1, HIDDEN))
    w2p = jnp.zeros((HIDDEN_PAD, OUT_PAD), jnp.bfloat16
                    ).at[:HIDDEN, :NUM_CLASSES].set(w2.astype(jnp.bfloat16))
    b2p = jnp.zeros((1, OUT_PAD), jnp.float32
                    ).at[:, :NUM_CLASSES].set(b2.reshape(1, NUM_CLASSES))

    # Batch tiling: TB-row tiles (<=512 keeps double-buffered bf16 x tiles and
    # resident weights far inside v7x's 32 MiB scoped VMEM). Pad B up.
    tb = min(block_b, _round_up(B, 16))
    b_pad = _round_up(B, tb)
    x_bf = x.astype(jnp.bfloat16)
    if b_pad != B:
        x_bf = jnp.pad(x_bf, ((0, b_pad - B), (0, 0)))

    grid = (b_pad // tb,)
    flops = 2 * b_pad * INPUT_SIZE * HIDDEN_PAD + 2 * b_pad * HIDDEN_PAD * OUT_PAD
    bytes_accessed = (x_bf.size * 2 + w1p.size * 2 + w2p.size * 2
                      + b1p.size * 4 + b2p.size * 4 + b_pad * OUT_PAD * 4)

    out_padded = pl.pallas_call(
        mlp_kernel,
        out_shape=jax.ShapeDtypeStruct((b_pad, OUT_PAD), jnp.float32),
        grid=grid,
        in_specs=[
            pl.BlockSpec((tb, INPUT_SIZE), lambda i: (i, 0)),          # x tile
            pl.BlockSpec((INPUT_SIZE, HIDDEN_PAD), lambda i: (0, 0)),  # w1 (resident)
            pl.BlockSpec((1, HIDDEN_PAD), lambda i: (0, 0)),           # b1 (resident)
            pl.BlockSpec((HIDDEN_PAD, OUT_PAD), lambda i: (0, 0)),     # w2 (resident)
            pl.BlockSpec((1, OUT_PAD), lambda i: (0, 0)),              # b2 (resident)
        ],
        out_specs=pl.BlockSpec((tb, OUT_PAD), lambda i: (i, 0)),
        compiler_params=pltpu.CompilerParams(
            dimension_semantics=("parallel",)),
        cost_estimate=pl.CostEstimate(
            flops=flops, transcendentals=0, bytes_accessed=bytes_accessed),
    )(x_bf, w1p, b1p, w2p, b2p)

    # Slice back to the real batch and the 10 real classes (lane-dense store
    # inside the kernel, cheap slice outside).
    return out_padded[:B, :NUM_CLASSES]


def init_params(key):
    # Mirror nn.Linear init: U(-1/sqrt(fan_in), 1/sqrt(fan_in)) for W and b.
    k1, k2, k3, k4 = jax.random.split(key, 4)
    bound1 = 1.0 / jnp.sqrt(INPUT_SIZE)
    bound2 = 1.0 / jnp.sqrt(HIDDEN)
    # Stored as (in, out) = transpose of PyTorch's (out, in) weight layout.
    w1 = jax.random.uniform(k1, (INPUT_SIZE, HIDDEN), jnp.float32, -bound1, bound1)
    b1 = jax.random.uniform(k2, (HIDDEN,), jnp.float32, -bound1, bound1)
    w2 = jax.random.uniform(k3, (HIDDEN, NUM_CLASSES), jnp.float32, -bound2, bound2)
    b2 = jax.random.uniform(k4, (NUM_CLASSES,), jnp.float32, -bound2, bound2)
    return w1, b1, w2, b2


if __name__ == "__main__":
    key = jax.random.PRNGKey(0)
    key_x, key_p = jax.random.split(key)

    B = 8
    x = jax.random.normal(key_x, (B, INPUT_SIZE), jnp.float32)
    w1, b1, w2, b2 = init_params(key_p)

    out = nn_forward(x, w1, b1, w2, b2)
    jax.block_until_ready(out)

    # Reference in plain f32 JAX (same math as the PyTorch forward).
    ref = jnp.maximum(x @ w1 + b1[None, :], 0.0) @ w2 + b2[None, :]
    assert out.shape == (B, NUM_CLASSES)
    # bf16 MXU operands -> allow modest tolerance vs the f32 reference.
    assert jnp.allclose(out, ref, atol=2e-2, rtol=2e-2), (
        float(jnp.max(jnp.abs(out - ref))))

    print("KERNEL_OK")
</pallas_src>

<mosaic_0001>
module attributes {stable_mosaic.version = 11 : i64} {
  func.func @mlp_kernel(%arg0: i32, %arg1: memref<16x784xbf16, #tpu.memory_space<vmem>>, %arg2: memref<784x128xbf16, #tpu.memory_space<vmem>>, %arg3: memref<1x128xf32, #tpu.memory_space<vmem>>, %arg4: memref<128x128xbf16, #tpu.memory_space<vmem>>, %arg5: memref<1x128xf32, #tpu.memory_space<vmem>>, %arg6: memref<16x128xf32, #tpu.memory_space<vmem>>) attributes {dimension_semantics = [#tpu.dimension_semantics<parallel>], iteration_bounds = array<i64: 1>, scalar_prefetch = 0 : i64, scratch_operands = 0 : i64, tpu.core_type = #tpu.core_type<tc>, window_params = [{transform_indices = @transform_0, window_bounds = array<i64: 16, 784>}, {pipeline_mode = #tpu.pipeline_mode<synchronous>, transform_indices = @transform_1, window_bounds = array<i64: 784, 128>}, {pipeline_mode = #tpu.pipeline_mode<synchronous>, transform_indices = @transform_2, window_bounds = array<i64: 1, 128>}, {pipeline_mode = #tpu.pipeline_mode<synchronous>, transform_indices = @transform_3, window_bounds = array<i64: 128, 128>}, {pipeline_mode = #tpu.pipeline_mode<synchronous>, transform_indices = @transform_4, window_bounds = array<i64: 1, 128>}, {transform_indices = @transform_5, window_bounds = array<i64: 16, 128>}]} {
    %c0 = arith.constant 0 : index
    %c0_0 = arith.constant 0 : index
    %0 = vector.load %arg1[%c0, %c0_0] : memref<16x784xbf16, #tpu.memory_space<vmem>>, vector<16x784xbf16>
    %c0_1 = arith.constant 0 : index
    %c0_2 = arith.constant 0 : index
    %1 = vector.load %arg2[%c0_1, %c0_2] : memref<784x128xbf16, #tpu.memory_space<vmem>>, vector<784x128xbf16>
    %cst = arith.constant dense<0.000000e+00> : vector<16x128xf32>
    %2 = tpu.matmul %0, %1, %cst {dimension_numbers = #tpu.dot_dimension_numbers<[1], [0], [0], [1], [0, 0, 1, 1], [], []>} : vector<16x784xbf16>, vector<784x128xbf16>, vector<16x128xf32> -> vector<16x128xf32>
    %c0_3 = arith.constant 0 : index
    %c0_4 = arith.constant 0 : index
    %3 = vector.load %arg3[%c0_3, %c0_4] : memref<1x128xf32, #tpu.memory_space<vmem>>, vector<1x128xf32>
    %4 = vector.broadcast %3 : vector<1x128xf32> to vector<16x128xf32>
    %5 = arith.addf %2, %4 : vector<16x128xf32>
    %cst_5 = arith.constant 0.000000e+00 : f32
    %6 = vector.broadcast %cst_5 : f32 to vector<16x128xf32>
    %7 = arith.maximumf %5, %6 : vector<16x128xf32>
    %8 = arith.truncf %7 : vector<16x128xf32> to vector<16x128xbf16>
    %c0_6 = arith.constant 0 : index
    %c0_7 = arith.constant 0 : index
    %9 = vector.load %arg4[%c0_6, %c0_7] : memref<128x128xbf16, #tpu.memory_space<vmem>>, vector<128x128xbf16>
    %cst_8 = arith.constant dense<0.000000e+00> : vector<16x128xf32>
    %10 = tpu.matmul %8, %9, %cst_8 {dimension_numbers = #tpu.dot_dimension_numbers<[1], [0], [0], [1], [0, 0, 1, 1], [], []>} : vector<16x128xbf16>, vector<128x128xbf16>, vector<16x128xf32> -> vector<16x128xf32>
    %c0_9 = arith.constant 0 : index
    %c0_10 = arith.constant 0 : index
    %11 = vector.load %arg5[%c0_9, %c0_10] : memref<1x128xf32, #tpu.memory_space<vmem>>, vector<1x128xf32>
    %12 = vector.broadcast %11 : vector<1x128xf32> to vector<16x128xf32>
    %13 = arith.addf %10, %12 : vector<16x128xf32>
    %c0_11 = arith.constant 0 : index
    %c0_12 = arith.constant 0 : index
    %14 = vector.load %arg6[%c0_11, %c0_12] : memref<16x128xf32, #tpu.memory_space<vmem>>, vector<16x128xf32>
    tpu.vector_store %arg6[%c0_11, %c0_12], %13 {strides = array<i32>} : memref<16x128xf32, #tpu.memory_space<vmem>>, vector<16x128xf32>,
    return
  }
  func.func @transform_0(%arg0: i32) -> (i32, i32) {
    %c0_i32 = arith.constant 0 : i32
    %c0_i32_0 = arith.constant 0 : i32
    return %arg0, %c0_i32 : i32, i32
  }
  func.func @transform_1(%arg0: i32) -> (i32, i32) {
    %c0_i32 = arith.constant 0 : i32
    %c0_i32_0 = arith.constant 0 : i32
    %c0_i32_1 = arith.constant 0 : i32
    return %c0_i32, %c0_i32_0 : i32, i32
  }
  func.func @transform_2(%arg0: i32) -> (i32, i32) {
    %c0_i32 = arith.constant 0 : i32
    %c0_i32_0 = arith.constant 0 : i32
    %c0_i32_1 = arith.constant 0 : i32
    return %c0_i32, %c0_i32_0 : i32, i32
  }
  func.func @transform_3(%arg0: i32) -> (i32, i32) {
    %c0_i32 = arith.constant 0 : i32
    %c0_i32_0 = arith.constant 0 : i32
    %c0_i32_1 = arith.constant 0 : i32
    return %c0_i32, %c0_i32_0 : i32, i32
  }
  func.func @transform_4(%arg0: i32) -> (i32, i32) {
    %c0_i32 = arith.constant 0 : i32
    %c0_i32_0 = arith.constant 0 : i32
    %c0_i32_1 = arith.constant 0 : i32
    return %c0_i32, %c0_i32_0 : i32, i32
  }
  func.func @transform_5(%arg0: i32) -> (i32, i32) {
    %c0_i32 = arith.constant 0 : i32
    %c0_i32_0 = arith.constant 0 : i32
    return %arg0, %c0_i32 : i32, i32
  }
}

</mosaic_0001>

<bundles_post_ra>
// kernel: tpu_custom_call.1
= control target key start
LH: loop header
LB: loop body
LE: loop exit
PB: predicated region body
PF: predicated region fallthrough
CT: control target
= control target key end

     0   :  { %10 = vsyncpa [#allocation3], 0  ;;  %s1266_s0 = inlined_call_operand.hbm [shape: bf16[16,784], index: 0, kind: input, shape index: {}]   ;;  %s1267_s1 = inlined_call_operand.hbm [shape: bf16[784,128], index: 1, kind: input, shape index: {}]   ;;  %s1268_s2 = inlined_call_operand.vmem [shape: f32[1,128], index: 2, kind: input, shape index: {}]   ;;  %s1269_s3 = inlined_call_operand.hbm [shape: bf16[128,128], index: 3, kind: input, shape index: {}]   ;;  %s1270_s4 = inlined_call_operand.vmem [shape: f32[1,128], index: 4, kind: input, shape index: {}]   ;;  %s1271_s5 = inlined_call_operand.hbm [shape: f32[16,128], index: 5, kind: output, shape index: {}]  }
   0x1   :  { %11 = vsyncpa [#allocation6], 0 }
   0x2   :  { %12 = vsyncpa [#allocation4], 0  ;;  %s1151_s18 = smov [#allocation5]   ;;  %s1057_s22 = scalar_lea.hbm %s1267_s1, 6272 }
   0x3   :  { %s30_s19 = sshll.u32 %s1151_s18, 4  ;;  %p1058_p0 = scmp.ne.s32.totalorder %s1267_s1, %s1057_s22  ;;  %s31_s19 = int_to_ptr.vmem [resolvable:$true] %s30_s19 }
   0x4   :  { %p1061_p1 = scmp.lt.u32.totalorder %s1057_s22, %s1267_s1 }
   0x6   :  { %p1063_p2 = pnand %p1061_p1, %p1058_p0 }
   0x8   :  { %1066 = shalt.err (!%p1063_p2)
}
   0x9   :  { %s1067_s27 = scalar_lea.vmem %s31_s19, 6272  ;;  %p1072_p4 = scmp.lt.s32.totalorder %s31_s19, %s31_s19 }
   0xa   :  { %p1068_p3 = scmp.ne.s32.totalorder %s31_s19, %s1067_s27  ;;  %p1073_p5 = scmp.lt.s32.totalorder %s1067_s27, %s1067_s27 }
   0xc   :  { %p1074_p6 = por %p1073_p5, %p1072_p4 }
   0xe   :  { %p1075_p7 = pnand %p1074_p6, %p1068_p3 }
  0x10   :  { %1078 = shalt.err (!%p1075_p7)
}
  0x11   :  { %s1152_s28 = smov 64   ;;  %s1153_s29 = smov 4  }
  0x12   :  { %36 = dma.hbm_to_vmem [thread:$0]  %s1267_s1, 6272, %s31_s19, [#allocation6], %s1152_s28, %s1152_s28, %s1153_s29  }
  0x13   :  { %s1154_s7 = smov [#allocation2]   ;;  %s1079_s11 = scalar_lea.hbm %s1266_s0, 896 }
  0x14   :  { %s18_s8 = sshll.u32 %s1154_s7, 4  ;;  %p1080_p8 = scmp.ne.s32.totalorder %s1266_s0, %s1079_s11  ;;  %s19_s8 = int_to_ptr.vmem [resolvable:$true] %s18_s8 }
  0x15   :  { %p1083_p9 = scmp.lt.u32.totalorder %s1079_s11, %s1266_s0 }
  0x17   :  { %p1085_p10 = pnand %p1083_p9, %p1080_p8 }
  0x19   :  { %1088 = shalt.err (!%p1085_p10)
}
  0x1a   :  { %s1089_s16 = scalar_lea.vmem %s19_s8, 896  ;;  %p1094_p12 = scmp.lt.s32.totalorder %s19_s8, %s19_s8 }
  0x1b   :  { %p1090_p11 = scmp.ne.s32.totalorder %s19_s8, %s1089_s16  ;;  %p1095_p13 = scmp.lt.s32.totalorder %s1089_s16, %s1089_s16 }
  0x1d   :  { %p1096_p0 = por %p1095_p13, %p1094_p12 }
  0x1f   :  { %p1097_p1 = pnand %p1096_p0, %p1090_p11 }
  0x21   :  { %1100 = shalt.err (!%p1097_p1)
}
  0x22   :  { %s1155_s1 = smov 448   ;;  %s1156_s17 = smov 28  }
  0x23   :  { %24 = dma.hbm_to_vmem [thread:$0]  %s1266_s0, 896, %s19_s8, [#allocation3], %s1155_s1, %s1155_s1, %s1156_s17  }
  0x24   :  { %s1157_s20 = smov [#allocation7]   ;;  %s1101_s24 = scalar_lea.hbm %s1269_s3, 1024 }
  0x25   :  { %s44_s21 = sshll.u32 %s1157_s20, 4  ;;  %p1102_p2 = scmp.ne.s32.totalorder %s1269_s3, %s1101_s24  ;;  %s45_s21 = int_to_ptr.vmem [resolvable:$true] %s44_s21 }
  0x26   :  { %p1105_p3 = scmp.lt.u32.totalorder %s1101_s24, %s1269_s3 }
  0x28   :  { %p1107_p4 = pnand %p1105_p3, %p1102_p2 }
  0x2a   :  { %1110 = shalt.err (!%p1107_p4)
}
  0x2b   :  { %s1111_s6 = scalar_lea.vmem %s45_s21, 1024  ;;  %p1116_p6 = scmp.lt.s32.totalorder %s45_s21, %s45_s21 }
  0x2c   :  { %p1112_p5 = scmp.ne.s32.totalorder %s45_s21, %s1111_s6  ;;  %p1117_p7 = scmp.lt.s32.totalorder %s1111_s6, %s1111_s6 }
  0x2e   :  { %p1118_p8 = por %p1117_p7, %p1116_p6 }
  0x30   :  { %p1119_p9 = pnand %p1118_p8, %p1112_p5 }
  0x32   :  { %1122 = shalt.err (!%p1119_p9)
}
  0x33   :  { %50 = dma.hbm_to_vmem [thread:$0]  %s1269_s3, 1024, %s45_s21, [#allocation6], %s1152_s28, %s1152_s28, %s1153_s29  }
  0x34   :  { %1145 = dma.done.wait [#allocation3], 896  }
  0x35   :  { %1146 = vsyncadd [#allocation3], 4294966400 }
  0x36   :  { %1147 = dma.done.wait [#allocation6], 7296  }
  0x37   :  { %1148 = vsyncadd [#allocation6], 4294960000  ;;  %v990_v0 = vld [vmem:[#allocation5 + $0x40] sm:$0xff]   ;;  %v994_v4 = vld [vmem:[#allocation5 + $0x48] sm:$0xff]   ;;  %v1158_v38 = vmov 0.0   ;;  %vm1159_vm0 = vmmov 0  }
  0x38   :  { %v991_v1 = vld [vmem:[#allocation5] sm:$0xff]   ;;  %875 = vmatprep.subr.bf16.mxu0 %v990_v0  ;;  %v995_v5 = vld [vmem:[#allocation5 + $0x8] sm:$0xff]   ;;  %v998_v8 = vld [vmem:[#allocation5 + $0x50] sm:$0xff]   ;;  %vm505_vm1 = vcmask 130048   ;;  %s1160_s8 = smov [#allocation8]  }
  0x39   :  { %v992_v2 = vld [vmem:[#allocation5 + $0xc0] sm:$0xff]   ;;  %876 = vmatpush3.bf16.msra.mxu0 %v991_v1  ;;  %v996_v6 = vld [vmem:[#allocation5 + $0xc8] sm:$0xff]   ;;  %v999_v9 = vld [vmem:[#allocation5 + $0x10] sm:$0xff]   ;;  %s795_s9 = sshll.u32 %s1160_s8, 4  ;;  %s796_s9 = int_to_ptr.vmem [resolvable:$true] %s795_s9 }
  0x3a   :  { %v993_v3 = vld [vmem:[#allocation5 + $0x80] sm:$0xff]   ;;  %897 = vmatprep.subr.bf16.mxu1 %v992_v2  ;;  %877 = vmatprep.subr.bf16.mxu0 %v994_v4  ;;  %v997_v7 = vld [vmem:[#allocation5 + $0x88] sm:$0xff]   ;;  %v1000_v10 = vld [vmem:[#allocation5 + $0xd0] sm:$0xff]   ;;  %s1123_s10 = scalar_lea.vmem %s796_s9, 256  ;;  %p1128_p11 = scmp.lt.s32.totalorder %s796_s9, %s796_s9 }
  0x3b   :  { %898 = vmatpush3.bf16.msra.mxu1 %v993_v3  ;;  %v1001_v11 = vld [vmem:[#allocation5 + $0x90] sm:$0xff]   ;;  %v1002_v12 = vld [vmem:[#allocation5 + $0x58] sm:$0xff]   ;;  %v1006_v16 = vld [vmem:[#allocation5 + $0x60] sm:$0xff]   ;;  %p1124_p10 = scmp.ne.s32.totalorder %s796_s9, %s1123_s10  ;;  %p1129_p12 = scmp.lt.s32.totalorder %s1123_s10, %s1123_s10 }
  0x3c   :  { %899 = vmatprep.subr.bf16.mxu1 %v996_v6  ;;  %v1003_v13 = vld [vmem:[#allocation5 + $0x18] sm:$0xff]   ;;  %v1007_v17 = vld [vmem:[#allocation5 + $0x20] sm:$0xff]   ;;  %v1010_v20 = vld [vmem:[#allocation5 + $0x68] sm:$0xff]  }
  0x3d   :  { %878 = vmatpush3.bf16.msra.mxu0 %v995_v5  ;;  %v1004_v14 = vld [vmem:[#allocation5 + $0xd8] sm:$0xff]   ;;  %v1008_v18 = vld [vmem:[#allocation5 + $0xe0] sm:$0xff]   ;;  %v1011_v21 = vld [vmem:[#allocation5 + $0x28] sm:$0xff]   ;;  %p1130_p13 = por %p1129_p12, %p1128_p11 }
  0x3e   :  { %879 = vmatprep.subr.bf16.mxu0 %v998_v8  ;;  %v1005_v15 = vld [vmem:[#allocation5 + $0x98] sm:$0xff]   ;;  %v1009_v19 = vld [vmem:[#allocation5 + $0xa0] sm:$0xff]   ;;  %v1012_v22 = vld [vmem:[#allocation5 + $0xe8] sm:$0xff]  }
  0x3f   :  { %900 = vmatpush3.bf16.msra.mxu1 %v997_v7  ;;  %v1013_v23 = vld [vmem:[#allocation5 + $0xa8] sm:$0xff]   ;;  %v1014_v24 = vld [vmem:[#allocation5 + $0x70] sm:$0xff]   ;;  %v1018_v28 = vld [vmem:[#allocation5 + $0x78] sm:$0xff]   ;;  %p1131_p0 = pnand %p1130_p13, %p1124_p10 }
  0x40   :  { %901 = vmatprep.subr.bf16.mxu1 %v1000_v10  ;;  %v1015_v25 = vld [vmem:[#allocation5 + $0x30] sm:$0xff]   ;;  %v1019_v29 = vld [vmem:[#allocation5 + $0x38] sm:$0xff]   ;;  %v1021_v31 = vld [vmem:[#allocation2] ss:$28 sps:$4 sm:$0xff]  }
  0x41   :  { %880 = vmatpush3.bf16.msra.mxu0 %v999_v9  ;;  %v1016_v26 = vld [vmem:[#allocation5 + $0xf0] sm:$0xff]   ;;  %v1020_v30 = vld [vmem:[#allocation5 + $0xf8] sm:$0xff]   ;;  %v1023_v32 = vld [vmem:[#allocation2 + $0x4] ss:$28 sps:$4 sm:$0xff]  }
  0x42   :  { %881 = vmatprep.subr.bf16.mxu0 %v1002_v12  ;;  %v1017_v27 = vld [vmem:[#allocation5 + $0xb0] sm:$0xff]   ;;  %v1024_v33 = vld [vmem:[#allocation5 + $0xb8] sm:$0xff]   ;;  %541 = vmatprep.mubr.bf16.mxu0 %v1023_v32  ;;  %v1025_v34 = vld [vmem:[#allocation5 + $0x140] sm:$0xff]  }
  0x43   :  { %902 = vmatpush3.bf16.msra.mxu1 %v1001_v11  ;;  %v1026_v35 = vld [vmem:[#allocation2 + $0x8] ss:$28 sps:$4 sm:$0xff]   ;;  %v1029_v37 = vld [vmem:[#allocation5 + $0x100] sm:$0xff]   ;;  %v1034_v43 = vld [vmem:[#allocation5 + $0x158] sm:$0xff]  }
  0x44   :  { %903 = vmatprep.subr.bf16.mxu1 %v1004_v14  ;;  %v1028_v36 = vld [vmem:[#allocation2 + $0xc] ss:$28 sps:$4 sm:$0xff]   ;;  %v1030_v39 = vld [vmem:[#allocation5 + $0x148] sm:$0xff]   ;;  %v1035_v44 = vld [vmem:[#allocation5 + $0x118] sm:$0xff]  }
  0x45   :  { %882 = vmatpush3.bf16.msra.mxu0 %v1003_v13  ;;  %582 = vmatprep.mubr.bf16.mxu1 %v1028_v36  ;;  %v1031_v40 = vld [vmem:[#allocation5 + $0x108] sm:$0xff]   ;;  %v1032_v41 = vld [vmem:[#allocation5 + $0x150] sm:$0xff]   ;;  %v1036_v45 = vld [vmem:[#allocation5 + $0x160] sm:$0xff]  }
  0x46   :  { %883 = vmatprep.subr.bf16.mxu0 %v1006_v16  ;;  %v1033_v42 = vld [vmem:[#allocation5 + $0x110] sm:$0xff]   ;;  %v1037_v46 = vld [vmem:[#allocation5 + $0x120] sm:$0xff]   ;;  %v1038_v47 = vld [vmem:[#allocation5 + $0x168] sm:$0xff]  }
  0x47   :  { %904 = vmatpush3.bf16.msra.mxu1 %v1005_v15  ;;  %v1044_v48 = vld [vmem:[#allocation5 + $0x180] sm:$0xff]   ;;  %v1039_v49 = vld [vmem:[#allocation5 + $0x128] sm:$0xff]   ;;  %v1047_v50 = vld [vmem:[#allocation2 + $0x14] ss:$28 sps:$4 sm:$0xff]  }
  0x48   :  { %905 = vmatprep.subr.bf16.mxu1 %v1008_v18  ;;  %v1040_v51 = vld [vmem:[#allocation5 + $0x170] sm:$0xff]   ;;  %v1048_v52 = vld [vmem:[#allocation2 + $0x18] ss:$28 sps:$4 sm:$0xff]   ;;  %v1049_v57 = vld [vmem:[#allocation7] sm:$0xff]  }
  0x49   :  { %884 = vmatpush3.bf16.msra.mxu0 %v1007_v17  ;;  %v1041_v53 = vld [vmem:[#allocation5 + $0x130] sm:$0xff]   ;;  %v1042_v54 = vld [vmem:[#allocation5 + $0x178] sm:$0xff]   ;;  %v1052_v60 = vld [vmem:[#allocation7 + $0x18] sm:$0xff]  }
  0x4a   :  { %885 = vmatprep.subr.bf16.mxu0 %v1010_v20  ;;  %v1043_v55 = vld [vmem:[#allocation5 + $0x138] sm:$0xff]   ;;  %v1050_v58 = vld [vmem:[#allocation7 + $0x8] sm:$0xff]   ;;  %v1053_v61 = vld [vmem:[#allocation7 + $0x20] sm:$0xff]  }
  0x4b   :  { %906 = vmatpush3.bf16.msra.mxu1 %v1009_v19  ;;  %v1045_v56 = vld [vmem:[#allocation2 + $0x10] ss:$28 sps:$4 sm:$0xff]   ;;  %v1056_v0 = vld [vmem:[#allocation7 + $0x38] sm:$0xff]   ;;  %v808_v2 = vld [vmem:[%s1268_s2] ss:$0 sm:$0xff] }
  0x4c   :  { %907 = vmatprep.subr.bf16.mxu1 %v1012_v22  ;;  %v1051_v59 = vld [vmem:[#allocation7 + $0x10] sm:$0xff]   ;;  %v1054_v62 = vld [vmem:[#allocation7 + $0x28] sm:$0xff]  }
  0x4d   :  { %886 = vmatpush3.bf16.msra.mxu0 %v1011_v21  ;;  %v1055_v63 = vld [vmem:[#allocation7 + $0x30] sm:$0xff]  }
  0x4e   :  { %887 = vmatprep.subr.bf16.mxu0 %v1014_v24 }
  0x4f   :  { %908 = vmatpush3.bf16.msra.mxu1 %v1013_v23 }
  0x50   :  { %909 = vmatprep.subr.bf16.mxu1 %v1016_v26 }
  0x51   :  { %888 = vmatpush3.bf16.msra.mxu0 %v1015_v25 }
  0x52   :  { %889 = vmatprep.subr.bf16.mxu0 %v1018_v28 }
  0x53   :  { %910 = vmatpush3.bf16.msra.mxu1 %v1017_v27 }
  0x54   :  { %911 = vmatprep.subr.bf16.mxu1 %v1020_v30 }
  0x55   :  { %890 = vmatpush3.bf16.msra.mxu0 %v1019_v29 }
  0x56   :  { %919 = vmatprep.subr.bf16.mxu0 %v1025_v34 }
  0x57   :  { %912 = vmatpush3.bf16.msra.mxu1 %v1024_v33 }
  0x58   :  { %542 = vmatmul.mubr.bf16.vlgmr.msra.gmra.mrb[0].mxu0 %v1021_v31  ;;  %952 = vmatprep.subr.bf16.mxu1 %v1158_v38 }
  0x59   :  { %920 = vmatpush3.bf16.msra.mxu0 %v1029_v37  ;;  %623 = vmatprep.mubr.bf16.mxu0 %v1047_v50 }
  0x5a   :  { %583 = vmatmul.mubr.bf16.vlgmr.msra.gmra.mrb[0].mxu1 %v1026_v35  ;;  %921 = vmatprep.subr.bf16.mxu0 %v1030_v39  ;;  %v866_v35 = vld [vmem:[%s1270_s4] ss:$0 sm:$0xff] }
  0x5b   :  { %954 = vmatprep.mubr.msk.bf16.mxu1 %vm1159_vm0, %v1158_v38  ;;  %953 = vmatpush3.bf16.msra.mxu1 %v1044_v48 }
  0x5c   :  { %958 = vmatprep.subr.bf16.mxu1 %v1158_v38 }
  0x5d   :  { %922 = vmatpush3.bf16.msra.mxu0 %v1031_v40 }
  0x5e   :  { %923 = vmatprep.subr.bf16.mxu0 %v1032_v41 }
  0x61   :  { %924 = vmatpush3.bf16.msra.mxu0 %v1033_v42 }
  0x62   :  { %925 = vmatprep.subr.bf16.mxu0 %v1034_v43  ;;  %955 = vmatmul.mubr.msk.bf16.vlgmr.msra.gmra.mrb[4].mxu1 %vm505_vm1, %v1048_v52 }
  0x63   :  { %974 = vmatprep.mubr.msk.bf16.mxu1 %vm1159_vm0, %v1158_v38  ;;  %959 = vmatpush3.bf16.msra.mxu1 %v1049_v57 }
  0x64   :  { %960 = vmatprep.subr.bf16.mxu1 %v1158_v38 }
  0x65   :  { %926 = vmatpush3.bf16.msra.mxu0 %v1035_v44 }
  0x66   :  { %927 = vmatprep.subr.bf16.mxu0 %v1036_v45 }
  0x67   :  { %961 = vmatpush3.bf16.msra.mxu1 %v1050_v58 }
  0x68   :  { %962 = vmatprep.subr.bf16.mxu1 %v1158_v38 }
  0x69   :  { %928 = vmatpush3.bf16.msra.mxu0 %v1037_v46 }
  0x6a   :  { %929 = vmatprep.subr.bf16.mxu0 %v1038_v47 }
  0x6b   :  { %963 = vmatpush3.bf16.msra.mxu1 %v1051_v59 }
  0x6c   :  { %964 = vmatprep.subr.bf16.mxu1 %v1158_v38 }
  0x6d   :  { %930 = vmatpush3.bf16.msra.mxu0 %v1039_v49 }
  0x6e   :  { %931 = vmatprep.subr.bf16.mxu0 %v1040_v51 }
  0x6f   :  { %965 = vmatpush3.bf16.msra.mxu1 %v1052_v60 }
  0x70   :  { %966 = vmatprep.subr.bf16.mxu1 %v1158_v38 }
  0x71   :  { %932 = vmatpush3.bf16.msra.mxu0 %v1041_v53 }
  0x72   :  { %933 = vmatprep.subr.bf16.mxu0 %v1042_v54 }
  0x73   :  { %967 = vmatpush3.bf16.msra.mxu1 %v1053_v61 }
  0x74   :  { %968 = vmatprep.subr.bf16.mxu1 %v1158_v38 }
  0x75   :  { %934 = vmatpush3.bf16.msra.mxu0 %v1043_v55 }
  0x77   :  { %969 = vmatpush3.bf16.msra.mxu1 %v1054_v62 }
  0x78   :  { %624 = vmatmul.mubr.bf16.vlgmr.msra.gmra.mrb[4].mxu0 %v1045_v56  ;;  %970 = vmatprep.subr.bf16.mxu1 %v1158_v38 }
  0x7b   :  { %971 = vmatpush3.bf16.msra.mxu1 %v1055_v63 }
  0x7c   :  { %972 = vmatprep.subr.bf16.mxu1 %v1158_v38 }
  0x7f   :  { %973 = vmatpush3.bf16.msra.mxu1 %v1056_v0 }
 0x12b   :  { %v891_v1 = vpop.f32.mrb[0].mxu0 }
 0x12c   :  { %v892_v3 = vpop.f32.mrb[1].mxu0 }
 0x12d   :  { %v893_v4 = vadd.f32 %v892_v3, %v891_v1  ;;  %v894_v5 = vpop.f32.mrb[2].mxu0  ;;  %v913_v6 = vpop.f32.mrb[0].mxu1 }
 0x12e   :  { %v895_v7 = vpop.f32.mrb[3].mxu0  ;;  %v914_v10 = vpop.f32.mrb[1].mxu1 }
 0x12f   :  { %v544_v8 = vadd.f32 %v893_v4, %v808_v2  ;;  %v896_v9 = vadd.f32 %v895_v7, %v894_v5  ;;  %v915_v11 = vadd.f32 %v914_v10, %v913_v6  ;;  %v916_v12 = vpop.f32.mrb[2].mxu1 }
 0x130   :  { %v917_v14 = vpop.f32.mrb[3].mxu1 }
 0x131   :  { %v547_v13 = vadd.f32 %v896_v9, %v808_v2  ;;  %v585_v15 = vadd.f32 %v915_v11, %v544_v8  ;;  %v918_v16 = vadd.f32 %v917_v14, %v916_v12 }
 0x133   :  { %v588_v17 = vadd.f32 %v918_v16, %v547_v13 }
 0x135   :  { %v666_v18 = vpop.f32.mrb[4].mxu1 }
 0x136   :  { %v956_v19 = vpop.f32.mrb[5].mxu1 }
 0x137   :  { %v669_v20 = vpop.f32.mrb[6].mxu1 }
 0x138   :  { %v957_v21 = vpop.f32.mrb[7].mxu1 }
 0x14b   :  { %v935_v22 = vpop.f32.mrb[4].mxu0 }
 0x14c   :  { %v936_v23 = vpop.f32.mrb[5].mxu0 }
 0x14d   :  { %v937_v24 = vadd.f32 %v936_v23, %v935_v22  ;;  %v938_v25 = vpop.f32.mrb[6].mxu0 }
 0x14e   :  { %v939_v26 = vpop.f32.mrb[7].mxu0 }
 0x14f   :  { %v626_v27 = vadd.f32 %v937_v24, %v585_v15  ;;  %v940_v28 = vadd.f32 %v939_v26, %v938_v25 }
 0x151   :  { %v667_v29 = vadd.f32 %v666_v18, %v626_v27  ;;  %v629_v30 = vadd.f32 %v940_v28, %v588_v17 }
 0x153   :  { %v670_v31 = vadd.f32 %v669_v20, %v629_v30  ;;  %v673_v32 = vmax.f32 %v667_v29, 0.0 }
 0x155   :  { %v674_v33 = vmax.f32 %v670_v31, 0.0 }
 0x157   :  { %v675_v34 = vpack.c.bf16 %v674_v33, %v673_v32 }
 0x159   :  { %975 = vmatmul.mubr.bf16.vlgmr.msra.gmra.mrb[8].mxu1 %v675_v34 }
 0x22c   :  { %v781_v36 = vpop.f32.mrb[8].mxu1 }
 0x22d   :  { %v782_v37 = vadd.f32 %v866_v35, %v781_v36  ;;  %v976_v38 = vpop.f32.mrb[9].mxu1 }
 0x22e   :  { %v784_v39 = vpop.f32.mrb[10].mxu1 }
 0x22f   :  { %788 = vst [vmem:[#allocation8] sm:$0xff] %v782_v37  ;;  %v785_v40 = vadd.f32 %v866_v35, %v784_v39  ;;  %v977_v41 = vpop.f32.mrb[11].mxu1 }
 0x231   :  { %789 = vst [vmem:[#allocation8 + $0x8] sm:$0xff] %v785_v40 }
 0x232   :  { %1134 = shalt.err (!%p1131_p0)
}
 0x233   :  { %s1135_s12 = scalar_lea.hbm %s1271_s5, 256 }
 0x234   :  { %p1136_p1 = scmp.ne.s32.totalorder %s1271_s5, %s1135_s12  ;;  %p1139_p2 = scmp.lt.u32.totalorder %s1135_s12, %s1271_s5 }
 0x236   :  { %p1141_p3 = pnand %p1139_p2, %p1136_p1 }
 0x238   :  { %1144 = shalt.err (!%p1141_p3)
}
 0x239   :  { %s1161_s1 = smov 128   ;;  %s1162_s17 = smov 8  }
 0x23a   :  { %801 = dma.vmem_to_hbm [thread:$0]  %s796_s9, 256, %s1271_s5, [#allocation4], %s1161_s1, %s1161_s1, %s1162_s17  }
 0x23b   :  { %1149 = dma.done.wait [#allocation4], 256  }
 0x23c   :  { %1150 = vsyncadd [#allocation4], 4294967040 }
 0x23d   :  { %805 = vsyncpa [#allocation3], 1 }
 0x23e   :  { %806 = vsyncpa [#allocation6], 1 }
 0x23f   :  { %807 = vsyncpa [#allocation4], 1 }

</bundles_post_ra>
